<compile_context>
chip_gen: v6e
topology: v6e:2x2x1
jax: 0.10.0
libtpu: 0.0.40
codegen_flags: <defaults>
</compile_context>

<pallas_src>
import math
import functools

import jax
import jax.numpy as jnp
from jax import lax
from jax.experimental import pallas as pl
from jax.experimental.pallas import tpu as pltpu


# --------------------------- chip-aware VMEM budget / tiling ---------------------------
def _query_vmem_limit():
    try:
        cap = int(getattr(pltpu.get_tpu_info(), "vmem_capacity_bytes", 0))
    except Exception:
        cap = 0
    if cap <= 0:
        cap = 64 * 1024 * 1024  # conservative v7x-sized default
    # ~50 MiB on v7x (64 MiB physical), ~100 MiB on v5e/v6e (128 MiB physical)
    return min(int(cap * 0.78), 100 * 1024 * 1024)


_VMEM_LIMIT_BYTES = _query_vmem_limit()


def _row_tile(total):
    """Row (sublane-axis) tile: full extent if small, else a fixed 8-aligned tile.

    With pl.cdiv grid the partial last block is masked by Pallas, so no degenerate
    single-giant-block fallback."""
    target = 1024 if _VMEM_LIMIT_BYTES >= 96 * 1024 * 1024 else 512
    return total if total <= target else target


def _aligned_divisor_tile(total, target, align):
    """Largest divisor of `total` that is <= target and a multiple of `align`.

    Falls back to the full extent (always a legal block shape) if none exists."""
    if total <= target:
        return total
    t = (target // align) * align
    while t >= align:
        if total % t == 0:
            return t
        t -= align
    return total


# ----------------- Kernel 1: fused Q/K/V Linear + ReLU (one launch, M/D/E tiled) -----------------
def _qkv_proj_relu_kernel(xq_ref, xk_ref, xv_ref, w_ref, b_ref,
                          oq_ref, ok_ref, ov_ref,
                          accq, acck, accv):
    # xq/xk/xv: (TM, TK); w: (3, TK, TD); b: (3, 1, TD); outs: (TM, TD)
    k = pl.program_id(2)

    @pl.when(k == 0)
    def _():
        accq[...] = jnp.zeros_like(accq)
        acck[...] = jnp.zeros_like(acck)
        accv[...] = jnp.zeros_like(accv)

    accq[...] += jnp.dot(xq_ref[...], w_ref[0], preferred_element_type=jnp.float32)
    acck[...] += jnp.dot(xk_ref[...], w_ref[1], preferred_element_type=jnp.float32)
    accv[...] += jnp.dot(xv_ref[...], w_ref[2], preferred_element_type=jnp.float32)

    @pl.when(k == pl.num_programs(2) - 1)
    def _():
        oq_ref[...] = jnp.maximum(accq[...] + b_ref[0], 0.0).astype(oq_ref.dtype)
        ok_ref[...] = jnp.maximum(acck[...] + b_ref[1], 0.0).astype(ok_ref.dtype)
        ov_ref[...] = jnp.maximum(accv[...] + b_ref[2], 0.0).astype(ov_ref.dtype)


def qkv_proj_relu(xq, xk, xv, w, b):
    """xq/xk/xv: (NS, E); w: (3, E, D); b: (3, 1, D) -> three (NS, D) arrays."""
    NS, E = xq.shape
    D = w.shape[-1]
    TM = _row_tile(NS)
    TK = _aligned_divisor_tile(E, 512, 128)   # 128-deep contraction fills v5e's MXU exactly
    TD = _aligned_divisor_tile(D, 512, 128)

    x_spec = pl.BlockSpec((TM, TK), lambda i, j, k: (i, k))
    out_spec = pl.BlockSpec((TM, TD), lambda i, j, k: (i, j))
    out_sds = jax.ShapeDtypeStruct((NS, D), jnp.float32)

    return pl.pallas_call(
        _qkv_proj_relu_kernel,
        out_shape=(out_sds, out_sds, out_sds),
        grid=(pl.cdiv(NS, TM), D // TD, E // TK),
        in_specs=[
            x_spec, x_spec, x_spec,
            pl.BlockSpec((3, TK, TD), lambda i, j, k: (0, k, j)),
            pl.BlockSpec((3, 1, TD), lambda i, j, k: (0, 0, j)),
        ],
        out_specs=(out_spec, out_spec, out_spec),
        scratch_shapes=[
            pltpu.VMEM((TM, TD), jnp.float32),
            pltpu.VMEM((TM, TD), jnp.float32),
            pltpu.VMEM((TM, TD), jnp.float32),
        ],
        compiler_params=pltpu.CompilerParams(
            dimension_semantics=("parallel", "parallel", "arbitrary"),
            vmem_limit_bytes=_VMEM_LIMIT_BYTES,
        ),
    )(xq, xk, xv, w, b)


# --------------- Kernel 2: multi-head attention on the packed-head (lane-dense) layout ---------------
def _mha_kernel(q_ref, k_ref, v_ref, o_ref, *, head_size, head_dim):
    # q_ref/o_ref: (TQ, D); k_ref/v_ref: (S, D). Heads are contiguous lane slices of D.
    for h in range(head_size):          # static, unrolled; per-head live ranges only
        lo = h * head_dim
        qh = q_ref[:, lo:lo + head_dim]                 # scale already folded into wq/bq
        kh = k_ref[:, lo:lo + head_dim]
        # Contract the head dim directly (no explicit k.T -> no XLU transpose).
        s = lax.dot_general(qh, kh, (((1,), (1,)), ((), ())),
                            preferred_element_type=jnp.float32)       # (TQ, S)
        m = jnp.max(s, axis=-1, keepdims=True)
        e = jnp.exp(s - m)
        l = jnp.sum(e, axis=-1, keepdims=True)
        # Deferred softmax normalization: PV matmul on unnormalized probs, one reciprocal after.
        pv = jnp.dot(e, v_ref[:, lo:lo + head_dim],
                     preferred_element_type=jnp.float32)              # (TQ, head_dim)
        o_ref[:, lo:lo + head_dim] = (pv * pl.reciprocal(l, approx=False)).astype(o_ref.dtype)


def multi_head_attention(q, k, v, *, head_size, head_dim):
    """q, k, v: (N, S, D) packed-head projections -> (N, S, D) attention output."""
    N, S, D = q.shape
    TQ = S if S <= 256 else 256          # 8-aligned; partial last block masked by Pallas
    kern = functools.partial(_mha_kernel, head_size=head_size, head_dim=head_dim)
    return pl.pallas_call(
        kern,
        out_shape=jax.ShapeDtypeStruct((N, S, D), jnp.float32),
        grid=(N, pl.cdiv(S, TQ)),
        in_specs=[
            pl.BlockSpec((None, TQ, D), lambda n, t: (n, t, 0)),
            pl.BlockSpec((None, S, D), lambda n, t: (n, 0, 0)),   # K resident across q tiles
            pl.BlockSpec((None, S, D), lambda n, t: (n, 0, 0)),   # V resident across q tiles
        ],
        out_specs=pl.BlockSpec((None, TQ, D), lambda n, t: (n, t, 0)),
        compiler_params=pltpu.CompilerParams(
            dimension_semantics=("parallel", "parallel"),
            vmem_limit_bytes=_VMEM_LIMIT_BYTES,
        ),
    )(q, k, v)


# ------------------------------------ Module wrapper ------------------------------------
def init_params(key, emb_size, expand):
    D = emb_size * expand
    ks = jax.random.split(key, 6)
    bound = 1.0 / math.sqrt(emb_size)

    def u(k, shape):
        return jax.random.uniform(k, shape, jnp.float32, -bound, bound)

    return {
        "wq": u(ks[0], (emb_size, D)), "bq": u(ks[1], (D,)),
        "wk": u(ks[2], (emb_size, D)), "bk": u(ks[3], (D,)),
        "wv": u(ks[4], (emb_size, D)), "bv": u(ks[5], (D,)),
    }


def multi_attention(params, query, key, value, *, emb_size, head_size, expand):
    N, S, E = query.shape
    assert E == emb_size
    H = emb_size // head_size * expand     # head_embsize
    D = emb_size * expand                  # = head_size * H (packed-head feature dim)

    # Fold the 1/sqrt(H) softmax scale into the Q projection: ReLU(c*x) == c*ReLU(x) for c>0.
    scale = 1.0 / math.sqrt(H)
    w = jnp.stack([params["wq"] * scale, params["wk"], params["wv"]], axis=0)        # (3, E, D)
    b = jnp.stack([params["bq"] * scale, params["bk"], params["bv"]], axis=0).reshape(3, 1, D)

    # Activations go straight in (row-collapsing reshape is free, no stacked HBM copy).
    xq = query.reshape(N * S, E)
    xk = key.reshape(N * S, E)
    xv = value.reshape(N * S, E)

    q, k, v = qkv_proj_relu(xq, xk, xv, w, b)                      # each (N*S, D)
    q = q.reshape(N, S, D)
    k = k.reshape(N, S, D)
    v = v.reshape(N, S, D)

    # Attention consumes/produces the packed-head layout directly: output is already
    # (N, S, head_size*H) with no post-kernel transpose/reshape.
    return multi_head_attention(q, k, v, head_size=head_size, head_dim=H)


# ---------------------------------- Pure-JAX reference ----------------------------------
def _reshape_batch_ref(x, head_size, head_embsize):
    n, s, _ = x.shape
    return (x.reshape(n, s, head_size, head_embsize)
             .transpose(0, 2, 1, 3)
             .reshape(n * head_size, s, head_embsize))


def multi_attention_ref(params, query, key, value, *, emb_size, head_size, expand):
    N, S, E = query.shape
    H = emb_size // head_size * expand

    def proj(x, w, b):
        return jax.nn.relu(x @ w + b)

    Q = _reshape_batch_ref(proj(query, params["wq"], params["bq"]), head_size, H)
    K = _reshape_batch_ref(proj(key, params["wk"], params["bk"]), head_size, H)
    V = _reshape_batch_ref(proj(value, params["wv"], params["bv"]), head_size, H)
    w = jnp.einsum("bqh,bkh->bqk", Q, K) / math.sqrt(H)
    w = jax.nn.softmax(w, axis=-1)
    y = jnp.einsum("bqk,bkh->bqh", w, V)
    return (y.reshape(N, head_size, S, H)
             .transpose(0, 2, 1, 3)
             .reshape(N, S, head_size * H))


if __name__ == "__main__":
    emb_size, head_size, expand = 32, 4, 2
    N, S = 2, 8

    root = jax.random.PRNGKey(0)
    kp, kq, kk, kv = jax.random.split(root, 4)
    params = init_params(kp, emb_size, expand)

    query = jax.random.normal(kq, (N, S, emb_size), jnp.float32)
    key = jax.random.normal(kk, (N, S, emb_size), jnp.float32)
    value = jax.random.normal(kv, (N, S, emb_size), jnp.float32)

    out = multi_attention(params, query, key, value,
                          emb_size=emb_size, head_size=head_size, expand=expand)
    out = jax.block_until_ready(out)

    ref = multi_attention_ref(params, query, key, value,
                              emb_size=emb_size, head_size=head_size, expand=expand)
    assert out.shape == (N, S, emb_size * expand), out.shape
    assert jnp.allclose(out, ref, atol=2e-5, rtol=2e-5), "mismatch vs reference"

    print("KERNEL_OK")
</pallas_src>

<mosaic_0001>
module attributes {stable_mosaic.version = 11 : i64} {
  func.func @_qkv_proj_relu_kernel(%arg0: i32, %arg1: i32, %arg2: i32, %arg3: memref<16x32xf32, #tpu.memory_space<vmem>>, %arg4: memref<16x32xf32, #tpu.memory_space<vmem>>, %arg5: memref<16x32xf32, #tpu.memory_space<vmem>>, %arg6: memref<3x32x64xf32, #tpu.memory_space<vmem>>, %arg7: memref<3x1x64xf32, #tpu.memory_space<vmem>>, %arg8: memref<16x64xf32, #tpu.memory_space<vmem>>, %arg9: memref<16x64xf32, #tpu.memory_space<vmem>>, %arg10: memref<16x64xf32, #tpu.memory_space<vmem>>, %arg11: memref<16x64xf32, #tpu.memory_space<vmem>>, %arg12: memref<16x64xf32, #tpu.memory_space<vmem>>, %arg13: memref<16x64xf32, #tpu.memory_space<vmem>>) attributes {dimension_semantics = [#tpu.dimension_semantics<parallel>, #tpu.dimension_semantics<parallel>, #tpu.dimension_semantics<arbitrary>], iteration_bounds = array<i64: 1, 1, 1>, scalar_prefetch = 0 : i64, scratch_operands = 3 : i64, tpu.core_type = #tpu.core_type<tc>, window_params = [{transform_indices = @transform_0, window_bounds = array<i64: 16, 32>}, {transform_indices = @transform_1, window_bounds = array<i64: 16, 32>}, {transform_indices = @transform_2, window_bounds = array<i64: 16, 32>}, {transform_indices = @transform_3, window_bounds = array<i64: 3, 32, 64>}, {transform_indices = @transform_4, window_bounds = array<i64: 3, 1, 64>}, {transform_indices = @transform_5, window_bounds = array<i64: 16, 64>}, {transform_indices = @transform_6, window_bounds = array<i64: 16, 64>}, {transform_indices = @transform_7, window_bounds = array<i64: 16, 64>}]} {
    %c0_i32 = arith.constant 0 : i32
    %0 = arith.cmpi eq, %arg2, %c0_i32 : i32
    %1 = arith.extui %0 : i1 to i32
    %c0_i32_0 = arith.constant 0 : i32
    %2 = arith.cmpi ne, %1, %c0_i32_0 : i32
    scf.if %2 {
      %cst_29 = arith.constant 0.000000e+00 : f32
      %27 = vector.broadcast %cst_29 : f32 to vector<16x64xf32>
      %c0_30 = arith.constant 0 : index
      %c0_31 = arith.constant 0 : index
      %28 = vector.load %arg11[%c0_30, %c0_31] : memref<16x64xf32, #tpu.memory_space<vmem>>, vector<16x64xf32>
      tpu.vector_store %arg11[%c0_30, %c0_31], %27 {strides = array<i32>} : memref<16x64xf32, #tpu.memory_space<vmem>>, vector<16x64xf32>,
      %cst_32 = arith.constant 0.000000e+00 : f32
      %29 = vector.broadcast %cst_32 : f32 to vector<16x64xf32>
      %c0_33 = arith.constant 0 : index
      %c0_34 = arith.constant 0 : index
      %30 = vector.load %arg12[%c0_33, %c0_34] : memref<16x64xf32, #tpu.memory_space<vmem>>, vector<16x64xf32>
      tpu.vector_store %arg12[%c0_33, %c0_34], %29 {strides = array<i32>} : memref<16x64xf32, #tpu.memory_space<vmem>>, vector<16x64xf32>,
      %cst_35 = arith.constant 0.000000e+00 : f32
      %31 = vector.broadcast %cst_35 : f32 to vector<16x64xf32>
      %c0_36 = arith.constant 0 : index
      %c0_37 = arith.constant 0 : index
      %32 = vector.load %arg13[%c0_36, %c0_37] : memref<16x64xf32, #tpu.memory_space<vmem>>, vector<16x64xf32>
      tpu.vector_store %arg13[%c0_36, %c0_37], %31 {strides = array<i32>} : memref<16x64xf32, #tpu.memory_space<vmem>>, vector<16x64xf32>,
    } else {
    }
    %c0 = arith.constant 0 : index
    %c0_1 = arith.constant 0 : index
    %3 = vector.load %arg11[%c0, %c0_1] : memref<16x64xf32, #tpu.memory_space<vmem>>, vector<16x64xf32>
    %c0_2 = arith.constant 0 : index
    %c0_3 = arith.constant 0 : index
    %4 = vector.load %arg3[%c0_2, %c0_3] : memref<16x32xf32, #tpu.memory_space<vmem>>, vector<16x32xf32>
    %c0_4 = arith.constant 0 : index
    %c0_5 = arith.constant 0 : index
    %c0_6 = arith.constant 0 : index
    %5 = vector.load %arg6[%c0_4, %c0_5, %c0_6] : memref<3x32x64xf32, #tpu.memory_space<vmem>>, vector<1x32x64xf32>
    %6 = vector.shape_cast %5 : vector<1x32x64xf32> to vector<32x64xf32>
    %cst = arith.constant dense<0.000000e+00> : vector<16x64xf32>
    %7 = tpu.matmul %4, %6, %cst {dimension_numbers = #tpu.dot_dimension_numbers<[1], [0], [0], [1], [0, 0, 1, 1], [], []>} : vector<16x32xf32>, vector<32x64xf32>, vector<16x64xf32> -> vector<16x64xf32>
    %8 = arith.addf %3, %7 : vector<16x64xf32>
    %c0_7 = arith.constant 0 : index
    %c0_8 = arith.constant 0 : index
    %9 = vector.load %arg11[%c0_7, %c0_8] : memref<16x64xf32, #tpu.memory_space<vmem>>, vector<16x64xf32>
    tpu.vector_store %arg11[%c0_7, %c0_8], %8 {strides = array<i32>} : memref<16x64xf32, #tpu.memory_space<vmem>>, vector<16x64xf32>,
    %c0_9 = arith.constant 0 : index
    %c0_10 = arith.constant 0 : index
    %10 = vector.load %arg12[%c0_9, %c0_10] : memref<16x64xf32, #tpu.memory_space<vmem>>, vector<16x64xf32>
    %c0_11 = arith.constant 0 : index
    %c0_12 = arith.constant 0 : index
    %11 = vector.load %arg4[%c0_11, %c0_12] : memref<16x32xf32, #tpu.memory_space<vmem>>, vector<16x32xf32>
    %c1 = arith.constant 1 : index
    %c0_13 = arith.constant 0 : index
    %c0_14 = arith.constant 0 : index
    %12 = vector.load %arg6[%c1, %c0_13, %c0_14] : memref<3x32x64xf32, #tpu.memory_space<vmem>>, vector<1x32x64xf32>
    %13 = vector.shape_cast %12 : vector<1x32x64xf32> to vector<32x64xf32>
    %cst_15 = arith.constant dense<0.000000e+00> : vector<16x64xf32>
    %14 = tpu.matmul %11, %13, %cst_15 {dimension_numbers = #tpu.dot_dimension_numbers<[1], [0], [0], [1], [0, 0, 1, 1], [], []>} : vector<16x32xf32>, vector<32x64xf32>, vector<16x64xf32> -> vector<16x64xf32>
    %15 = arith.addf %10, %14 : vector<16x64xf32>
    %c0_16 = arith.constant 0 : index
    %c0_17 = arith.constant 0 : index
    %16 = vector.load %arg12[%c0_16, %c0_17] : memref<16x64xf32, #tpu.memory_space<vmem>>, vector<16x64xf32>
    tpu.vector_store %arg12[%c0_16, %c0_17], %15 {strides = array<i32>} : memref<16x64xf32, #tpu.memory_space<vmem>>, vector<16x64xf32>,
    %c0_18 = arith.constant 0 : index
    %c0_19 = arith.constant 0 : index
    %17 = vector.load %arg13[%c0_18, %c0_19] : memref<16x64xf32, #tpu.memory_space<vmem>>, vector<16x64xf32>
    %c0_20 = arith.constant 0 : index
    %c0_21 = arith.constant 0 : index
    %18 = vector.load %arg5[%c0_20, %c0_21] : memref<16x32xf32, #tpu.memory_space<vmem>>, vector<16x32xf32>
    %c2 = arith.constant 2 : index
    %c0_22 = arith.constant 0 : index
    %c0_23 = arith.constant 0 : index
    %19 = vector.load %arg6[%c2, %c0_22, %c0_23] : memref<3x32x64xf32, #tpu.memory_space<vmem>>, vector<1x32x64xf32>
    %20 = vector.shape_cast %19 : vector<1x32x64xf32> to vector<32x64xf32>
    %cst_24 = arith.constant dense<0.000000e+00> : vector<16x64xf32>
    %21 = tpu.matmul %18, %20, %cst_24 {dimension_numbers = #tpu.dot_dimension_numbers<[1], [0], [0], [1], [0, 0, 1, 1], [], []>} : vector<16x32xf32>, vector<32x64xf32>, vector<16x64xf32> -> vector<16x64xf32>
    %22 = arith.addf %17, %21 : vector<16x64xf32>
    %c0_25 = arith.constant 0 : index
    %c0_26 = arith.constant 0 : index
    %23 = vector.load %arg13[%c0_25, %c0_26] : memref<16x64xf32, #tpu.memory_space<vmem>>, vector<16x64xf32>
    tpu.vector_store %arg13[%c0_25, %c0_26], %22 {strides = array<i32>} : memref<16x64xf32, #tpu.memory_space<vmem>>, vector<16x64xf32>,
    %c0_i32_27 = arith.constant 0 : i32
    %24 = arith.cmpi eq, %arg2, %c0_i32_27 : i32
    %25 = arith.extui %24 : i1 to i32
    %c0_i32_28 = arith.constant 0 : i32
    %26 = arith.cmpi ne, %25, %c0_i32_28 : i32
    scf.if %26 {
      %c0_29 = arith.constant 0 : index
      %c0_30 = arith.constant 0 : index
      %27 = vector.load %arg11[%c0_29, %c0_30] : memref<16x64xf32, #tpu.memory_space<vmem>>, vector<16x64xf32>
      %c0_31 = arith.constant 0 : index
      %c0_32 = arith.constant 0 : index
      %c0_33 = arith.constant 0 : index
      %28 = vector.load %arg7[%c0_31, %c0_32, %c0_33] : memref<3x1x64xf32, #tpu.memory_space<vmem>>, vector<1x1x64xf32>
      %29 = vector.shape_cast %28 : vector<1x1x64xf32> to vector<1x64xf32>
      %30 = vector.broadcast %29 : vector<1x64xf32> to vector<16x64xf32>
      %31 = arith.addf %27, %30 : vector<16x64xf32>
      %cst_34 = arith.constant 0.000000e+00 : f32
      %32 = vector.broadcast %cst_34 : f32 to vector<16x64xf32>
      %33 = arith.maximumf %31, %32 : vector<16x64xf32>
      %c0_35 = arith.constant 0 : index
      %c0_36 = arith.constant 0 : index
      %34 = vector.load %arg8[%c0_35, %c0_36] : memref<16x64xf32, #tpu.memory_space<vmem>>, vector<16x64xf32>
      tpu.vector_store %arg8[%c0_35, %c0_36], %33 {strides = array<i32>} : memref<16x64xf32, #tpu.memory_space<vmem>>, vector<16x64xf32>,
      %c0_37 = arith.constant 0 : index
      %c0_38 = arith.constant 0 : index
      %35 = vector.load %arg12[%c0_37, %c0_38] : memref<16x64xf32, #tpu.memory_space<vmem>>, vector<16x64xf32>
      %c1_39 = arith.constant 1 : index
      %c0_40 = arith.constant 0 : index
      %c0_41 = arith.constant 0 : index
      %36 = vector.load %arg7[%c1_39, %c0_40, %c0_41] : memref<3x1x64xf32, #tpu.memory_space<vmem>>, vector<1x1x64xf32>
      %37 = vector.shape_cast %36 : vector<1x1x64xf32> to vector<1x64xf32>
      %38 = vector.broadcast %37 : vector<1x64xf32> to vector<16x64xf32>
      %39 = arith.addf %35, %38 : vector<16x64xf32>
      %cst_42 = arith.constant 0.000000e+00 : f32
      %40 = vector.broadcast %cst_42 : f32 to vector<16x64xf32>
      %41 = arith.maximumf %39, %40 : vector<16x64xf32>
      %c0_43 = arith.constant 0 : index
      %c0_44 = arith.constant 0 : index
      %42 = vector.load %arg9[%c0_43, %c0_44] : memref<16x64xf32, #tpu.memory_space<vmem>>, vector<16x64xf32>
      tpu.vector_store %arg9[%c0_43, %c0_44], %41 {strides = array<i32>} : memref<16x64xf32, #tpu.memory_space<vmem>>, vector<16x64xf32>,
      %c0_45 = arith.constant 0 : index
      %c0_46 = arith.constant 0 : index
      %43 = vector.load %arg13[%c0_45, %c0_46] : memref<16x64xf32, #tpu.memory_space<vmem>>, vector<16x64xf32>
      %c2_47 = arith.constant 2 : index
      %c0_48 = arith.constant 0 : index
      %c0_49 = arith.constant 0 : index
      %44 = vector.load %arg7[%c2_47, %c0_48, %c0_49] : memref<3x1x64xf32, #tpu.memory_space<vmem>>, vector<1x1x64xf32>
      %45 = vector.shape_cast %44 : vector<1x1x64xf32> to vector<1x64xf32>
      %46 = vector.broadcast %45 : vector<1x64xf32> to vector<16x64xf32>
      %47 = arith.addf %43, %46 : vector<16x64xf32>
      %cst_50 = arith.constant 0.000000e+00 : f32
      %48 = vector.broadcast %cst_50 : f32 to vector<16x64xf32>
      %49 = arith.maximumf %47, %48 : vector<16x64xf32>
      %c0_51 = arith.constant 0 : index
      %c0_52 = arith.constant 0 : index
      %50 = vector.load %arg10[%c0_51, %c0_52] : memref<16x64xf32, #tpu.memory_space<vmem>>, vector<16x64xf32>
      tpu.vector_store %arg10[%c0_51, %c0_52], %49 {strides = array<i32>} : memref<16x64xf32, #tpu.memory_space<vmem>>, vector<16x64xf32>,
    } else {
    }
    return
  }
  func.func @transform_0(%arg0: i32, %arg1: i32, %arg2: i32) -> (i32, i32) {
    %c0_i32 = arith.constant 0 : i32
    return %arg0, %arg2 : i32, i32
  }
  func.func @transform_1(%arg0: i32, %arg1: i32, %arg2: i32) -> (i32, i32) {
    %c0_i32 = arith.constant 0 : i32
    return %arg0, %arg2 : i32, i32
  }
  func.func @transform_2(%arg0: i32, %arg1: i32, %arg2: i32) -> (i32, i32) {
    %c0_i32 = arith.constant 0 : i32
    return %arg0, %arg2 : i32, i32
  }
  func.func @transform_3(%arg0: i32, %arg1: i32, %arg2: i32) -> (i32, i32, i32) {
    %c0_i32 = arith.constant 0 : i32
    %c0_i32_0 = arith.constant 0 : i32
    return %c0_i32, %arg2, %arg1 : i32, i32, i32
  }
  func.func @transform_4(%arg0: i32, %arg1: i32, %arg2: i32) -> (i32, i32, i32) {
    %c0_i32 = arith.constant 0 : i32
    %c0_i32_0 = arith.constant 0 : i32
    %c0_i32_1 = arith.constant 0 : i32
    return %c0_i32, %c0_i32_0, %arg1 : i32, i32, i32
  }
  func.func @transform_5(%arg0: i32, %arg1: i32, %arg2: i32) -> (i32, i32) {
    %c0_i32 = arith.constant 0 : i32
    return %arg0, %arg1 : i32, i32
  }
  func.func @transform_6(%arg0: i32, %arg1: i32, %arg2: i32) -> (i32, i32) {
    %c0_i32 = arith.constant 0 : i32
    return %arg0, %arg1 : i32, i32
  }
  func.func @transform_7(%arg0: i32, %arg1: i32, %arg2: i32) -> (i32, i32) {
    %c0_i32 = arith.constant 0 : i32
    return %arg0, %arg1 : i32, i32
  }
}

</mosaic_0001>

<bundles_post_ra>
// kernel: tpu_custom_call.1
= control target key start
LH: loop header
LB: loop body
LE: loop exit
PB: predicated region body
PF: predicated region fallthrough
CT: control target
= control target key end

     0   :  { %13 = vsyncpa [#allocation6], 0  ;;  %s821_s0 = inlined_call_operand.hbm [shape: f32[16,32], index: 0, kind: input, shape index: {}]   ;;  %s822_s1 = inlined_call_operand.hbm [shape: f32[16,32], index: 1, kind: input, shape index: {}]   ;;  %s823_s2 = inlined_call_operand.hbm [shape: f32[16,32], index: 2, kind: input, shape index: {}]   ;;  %s824_s3 = inlined_call_operand.hbm [shape: f32[3,32,64], index: 3, kind: input, shape index: {}]   ;;  %s825_s4 = inlined_call_operand.vmem [shape: f32[3,1,64], index: 4, kind: input, shape index: {}]   ;;  %s826_s5 = inlined_call_operand.hbm [shape: f32[16,64], index: 5, kind: output, shape index: {0}]   ;;  %s827_s6 = inlined_call_operand.hbm [shape: f32[16,64], index: 6, kind: output, shape index: {1}]   ;;  %s828_s7 = inlined_call_operand.hbm [shape: f32[16,64], index: 7, kind: output, shape index: {2}]  }
   0x1   :  { %14 = vsyncpa [#allocation9], 0 }
   0x2   :  { %15 = vsyncpa [#allocation12], 0 }
   0x3   :  { %16 = vsyncpa [#allocation7], 0 }
   0x4   :  { %17 = vsyncpa [#allocation15], 0  ;;  %s696_s24 = smov [#allocation8]   ;;  %s697_s26 = smov [#allocation5]  }
   0x5   :  { %s35_s25 = sshll.u32 %s696_s24, 4  ;;  %s23_s27 = sshll.u32 %s697_s26, 4  ;;  %s36_s25 = int_to_ptr.vmem [resolvable:$true] %s35_s25  ;;  %s24_s27 = int_to_ptr.vmem [resolvable:$true] %s23_s27 }
   0x6   :  { %s554_s28 = scalar_lea.vmem %s36_s25, 256  ;;  %p559_p1 = scmp.lt.s32.totalorder %s36_s25, %s36_s25 }
   0x7   :  { %p555_p0 = scmp.ne.s32.totalorder %s36_s25, %s554_s28  ;;  %p560_p2 = scmp.lt.s32.totalorder %s554_s28, %s554_s28 }
   0x9   :  { %p561_p3 = por %p560_p2, %p559_p1 }
   0xb   :  { %p562_p4 = pnand %p561_p3, %p555_p0 }
   0xd   :  { %565 = shalt.err (!%p562_p4)
}
   0xe   :  { %s698_s29 = smov 128   ;;  %s699_s30 = smov 8  }
   0xf   :  { %41 = dma.hbm_to_vmem [thread:$0]  %s822_s1, 256, %s36_s25, [#allocation9], %s698_s29, %s698_s29, %s699_s30  }
  0x10   :  { %s574_s10 = scalar_lea.vmem %s24_s27, 256  ;;  %p579_p6 = scmp.lt.s32.totalorder %s24_s27, %s24_s27 }
  0x11   :  { %p575_p5 = scmp.ne.s32.totalorder %s24_s27, %s574_s10  ;;  %p580_p7 = scmp.lt.s32.totalorder %s574_s10, %s574_s10 }
  0x13   :  { %p581_p8 = por %p580_p7, %p579_p6 }
  0x15   :  { %p582_p9 = pnand %p581_p8, %p575_p5 }
  0x17   :  { %585 = shalt.err (!%p582_p9)
}
  0x18   :  { %29 = dma.hbm_to_vmem [thread:$0]  %s821_s0, 256, %s24_s27, [#allocation6], %s698_s29, %s698_s29, %s699_s30  }
  0x19   :  { %s700_s13 = smov [#allocation10]   ;;  %s701_s15 = smov [#allocation11]  }
  0x1a   :  { %s47_s14 = sshll.u32 %s700_s13, 4  ;;  %s59_s16 = sshll.u32 %s701_s15, 4  ;;  %s48_s14 = int_to_ptr.vmem [resolvable:$true] %s47_s14  ;;  %s60_s16 = int_to_ptr.vmem [resolvable:$true] %s59_s16 }
  0x1b   :  { %s594_s1 = scalar_lea.vmem %s48_s14, 256  ;;  %p599_p11 = scmp.lt.s32.totalorder %s48_s14, %s48_s14 }
  0x1c   :  { %p595_p10 = scmp.ne.s32.totalorder %s48_s14, %s594_s1  ;;  %p600_p12 = scmp.lt.s32.totalorder %s594_s1, %s594_s1 }
  0x1e   :  { %p601_p13 = por %p600_p12, %p599_p11 }
  0x20   :  { %p602_p0 = pnand %p601_p13, %p595_p10 }
  0x22   :  { %605 = shalt.err (!%p602_p0)
}
  0x23   :  { %53 = dma.hbm_to_vmem [thread:$0]  %s823_s2, 256, %s48_s14, [#allocation9], %s698_s29, %s698_s29, %s699_s30  }
  0x24   :  { %s614_s0 = scalar_lea.vmem %s60_s16, 1536  ;;  %p619_p2 = scmp.lt.s32.totalorder %s60_s16, %s60_s16 }
  0x25   :  { %p615_p1 = scmp.ne.s32.totalorder %s60_s16, %s614_s0  ;;  %p620_p3 = scmp.lt.s32.totalorder %s614_s0, %s614_s0 }
  0x27   :  { %p621_p4 = por %p620_p3, %p619_p2 }
  0x29   :  { %p622_p5 = pnand %p621_p4, %p615_p1 }
  0x2b   :  { %625 = shalt.err (!%p622_p5)
}
  0x2c   :  { %65 = dma.hbm_to_vmem [thread:$0]  %s824_s3, 1536, %s60_s16, [#allocation12], %s698_s29, %s698_s29, %s699_s30  }
  0x2d   :  { %686 = dma.done.wait [#allocation6], 256  }
  0x2e   :  { %687 = vsyncadd [#allocation6], 4294967040 }
  0x2f   :  { %688 = dma.done.wait [#allocation9], 512  }
  0x30   :  { %689 = vsyncadd [#allocation9], 4294966784 }
  0x31   :  { %690 = dma.done.wait [#allocation12], 1536  }
  0x32   :  { %691 = vsyncadd [#allocation12], 4294965760  ;;  %vm84_vm0 = vcmask 523264   ;;  %v702_v0 = vmov 0.0   ;;  %v98_v1 = vld [vmem:[#allocation11 + $0x18] sm:$0xff]  ;;  %v97_v2 = vld [vmem:[#allocation11 + $0x10] sm:$0xff] }
  0x33   :  { %86 = vst.msk [vmem:[#allocation2 + $0x8] sm:$0xff] %vm84_vm0, %v702_v0  ;;  %85 = vst.msk [vmem:[#allocation2] sm:$0xff] %vm84_vm0, %v702_v0  ;;  %503 = vmatprep.subr.mxu0 %v98_v1  ;;  %v194_v3 = vld [vmem:[#allocation11 + $0x38] sm:$0xff]  ;;  %v93_v4 = vld [vmem:[#allocation5] sm:$0xff]  ;;  %vm99_vm1 = vcmask 261120   ;;  %s703_s23 = smov [#allocation13]  }
  0x34   :  { %87 = vst.msk [vmem:[#allocation3] sm:$0xff] %vm84_vm0, %v702_v0  ;;  %88 = vst.msk [vmem:[#allocation3 + $0x8] sm:$0xff] %vm84_vm0, %v702_v0  ;;  %504 = vmatpush3.msra.mxu0 %v98_v1  ;;  %v96_v5 = vld [vmem:[#allocation11 + $0x8] sm:$0xff]  ;;  %514 = vmatprep.subr.mxu1 %v194_v3  ;;  %v193_v6 = vld [vmem:[#allocation11 + $0x30] sm:$0xff]  ;;  %s429_s24 = sshll.u32 %s703_s23, 4  ;;  %s704_s25 = smov [#allocation14]   ;;  %s430_s24 = int_to_ptr.vmem [resolvable:$true] %s429_s24 }
  0x35   :  { %89 = vst.msk [vmem:[#allocation4] sm:$0xff] %vm84_vm0, %v702_v0  ;;  %90 = vst.msk [vmem:[#allocation4 + $0x8] sm:$0xff] %vm84_vm0, %v702_v0  ;;  %505 = vmatprep.subr.mxu0 %v97_v2  ;;  %515 = vmatpush3.msra.mxu1 %v194_v3  ;;  %v95_v7 = vld [vmem:[#allocation11] sm:$0xff]  ;;  %v192_v8 = vld [vmem:[#allocation11 + $0x28] sm:$0xff]  ;;  %s441_s26 = sshll.u32 %s704_s25, 4  ;;  %s626_s8 = scalar_lea.vmem %s430_s24, 256  ;;  %s442_s26 = int_to_ptr.vmem [resolvable:$true] %s441_s26 }
  0x36   :  { %506 = vmatpush3.msra.mxu0 %v97_v2  ;;  %511 = vmatprep.mubr.msk.f32.mxu0 %vm99_vm1, %v93_v4  ;;  %v94_v9 = vld [vmem:[#allocation5 + $0x8] sm:$0xff]  ;;  %v191_v11 = vld [vmem:[#allocation11 + $0x20] sm:$0xff]  ;;  %v287_v12 = vld [vmem:[#allocation11 + $0x50] sm:$0xff]  ;;  %p627_p6 = scmp.ne.s32.totalorder %s430_s24, %s626_s8  ;;  %p631_p7 = scmp.lt.s32.totalorder %s430_s24, %s430_s24 }
  0x37   :  { %507 = vmatprep.subr.mxu0 %v96_v5  ;;  %516 = vmatprep.subr.mxu1 %v193_v6  ;;  %v288_v10 = vld [vmem:[#allocation11 + $0x58] sm:$0xff]  ;;  %v188_v13 = vld [vmem:[#allocation8] sm:$0xff]  ;;  %v286_v14 = vld [vmem:[#allocation11 + $0x48] sm:$0xff]  ;;  %p632_p8 = scmp.lt.s32.totalorder %s626_s8, %s626_s8 }
  0x38   :  { %508 = vmatpush3.msra.mxu0 %v96_v5  ;;  %517 = vmatpush3.msra.mxu1 %v193_v6  ;;  %v189_v15 = vld [vmem:[#allocation8 + $0x8] sm:$0xff]  ;;  %v282_v16 = vld [vmem:[#allocation10] sm:$0xff]  ;;  %v285_v17 = vld [vmem:[#allocation11 + $0x40] sm:$0xff] }
  0x39   :  { %509 = vmatprep.subr.mxu0 %v95_v7  ;;  %518 = vmatprep.subr.mxu1 %v192_v8  ;;  %v283_v18 = vld [vmem:[#allocation10 + $0x8] sm:$0xff]  ;;  %v480_v34 = vld [vmem:[%s825_s4] ss:$0 sm:$0xff]  ;;  %v482_v40 = vld [vmem:[%s825_s4 + $0x1] ss:$0 sm:$0xff]  ;;  %p633_p9 = por %p632_p8, %p631_p7 }
  0x3a   :  { %510 = vmatpush3.msra.mxu0 %v95_v7  ;;  %519 = vmatpush3.msra.mxu1 %v192_v8  ;;  %v92_v19 = vld [vmem:[#allocation2 + $0x8] sm:$0xff]  ;;  %v91_v21 = vld [vmem:[#allocation2] sm:$0xff] }
  0x3b   :  { %512 = vmatmul.mubr.msk.f32.vlgmr.msra.gmra.mxu0 %vm99_vm1, %v94_v9  ;;  %525 = vmatprep.subr.mxu0 %v288_v10  ;;  %v187_v24 = vld [vmem:[#allocation3 + $0x8] sm:$0xff]  ;;  %v186_v27 = vld [vmem:[#allocation3] sm:$0xff]  ;;  %v484_v48 = vld [vmem:[%s825_s4 + $0x2] ss:$0 sm:$0xff]  ;;  %p634_p10 = pnand %p633_p9, %p627_p6 }
  0x3c   :  { %526 = vmatpush3.msra.mxu0 %v288_v10  ;;  %520 = vmatprep.subr.mxu1 %v191_v11  ;;  %v281_v30 = vld [vmem:[#allocation4 + $0x8] sm:$0xff]  ;;  %v280_v33 = vld [vmem:[#allocation4] sm:$0xff] }
  0x3d   :  { %527 = vmatprep.subr.mxu0 %v287_v12  ;;  %521 = vmatpush3.msra.mxu1 %v191_v11 }
  0x3e   :  { %528 = vmatpush3.msra.mxu0 %v287_v12  ;;  %522 = vmatprep.mubr.msk.f32.mxu1 %vm99_vm1, %v188_v13 }
  0x3f   :  { %529 = vmatprep.subr.mxu0 %v286_v14  ;;  %523 = vmatmul.mubr.msk.f32.vlgmr.msra.gmra.mxu1 %vm99_vm1, %v189_v15 }
  0x40   :  { %530 = vmatpush3.msra.mxu0 %v286_v14  ;;  %533 = vmatprep.mubr.msk.f32.mxu0 %vm99_vm1, %v282_v16 }
  0x41   :  { %531 = vmatprep.subr.mxu0 %v285_v17 }
  0x42   :  { %532 = vmatpush3.msra.mxu0 %v285_v17 }
  0x43   :  { %534 = vmatmul.mubr.msk.f32.vlgmr.msra.gmra.mxu0 %vm99_vm1, %v283_v18 }
  0xfb   :  { %v513_v20 = vpop.f32.mrf.mxu0 }
  0xfc   :  { %v182_v22 = vadd.f32 %v513_v20, %v92_v19 }
  0xfd   :  { %v172_v23 = vpop.f32.mrf.mxu0 }
  0xfe   :  { %185 = vst.msk [vmem:[#allocation2 + $0x8] sm:$0xff] %vm84_vm0, %v182_v22  ;;  %v181_v25 = vadd.f32 %v172_v23, %v91_v21 }
  0xff   :  { %v524_v26 = vpop.f32.mrf.mxu1 }
 0x100   :  { %184 = vst.msk [vmem:[#allocation2] sm:$0xff] %vm84_vm0, %v181_v25  ;;  %v277_v28 = vadd.f32 %v524_v26, %v187_v24 }
 0x101   :  { %v267_v29 = vpop.f32.mrf.mxu1 }
 0x102   :  { %279 = vst.msk [vmem:[#allocation3 + $0x8] sm:$0xff] %vm84_vm0, %v277_v28  ;;  %v276_v31 = vadd.f32 %v267_v29, %v186_v27 }
 0x103   :  { %v535_v32 = vpop.f32.mrf.mxu0 }
 0x104   :  { %278 = vst.msk [vmem:[#allocation3] sm:$0xff] %vm84_vm0, %v276_v31  ;;  %v371_v35 = vadd.f32 %v535_v32, %v281_v30 }
 0x105   :  { %v361_v36 = vpop.f32.mrf.mxu0  ;;  %v378_v37 = vld [vmem:[#allocation2 + $0x8] sm:$0xff] }
 0x106   :  { %373 = vst.msk [vmem:[#allocation4 + $0x8] sm:$0xff] %vm84_vm0, %v371_v35  ;;  %v370_v38 = vadd.f32 %v361_v36, %v280_v33  ;;  %v387_v39 = vadd.f32 %v480_v34, %v378_v37 }
 0x107   :  { %v377_v41 = vld [vmem:[#allocation2] sm:$0xff] }
 0x108   :  { %372 = vst.msk [vmem:[#allocation4] sm:$0xff] %vm84_vm0, %v370_v38  ;;  %v386_v42 = vadd.f32 %v480_v34, %v377_v41  ;;  %v389_v43 = vmax.f32 %v387_v39, 0.0 }
 0x109   :  { %v393_v44 = vld [vmem:[#allocation3 + $0x8] sm:$0xff] }
 0x10a   :  { %v403_v45 = vadd.f32 %v482_v40, %v393_v44  ;;  %v388_v46 = vmax.f32 %v386_v42, 0.0  ;;  %391 = vst.msk [vmem:[#allocation13 + $0x8] sm:$0xff] %vm84_vm0, %v389_v43 }
 0x10b   :  { %v392_v47 = vld [vmem:[#allocation3] sm:$0xff] }
 0x10c   :  { %v402_v49 = vadd.f32 %v482_v40, %v392_v47  ;;  %v405_v50 = vmax.f32 %v403_v45, 0.0  ;;  %390 = vst.msk [vmem:[#allocation13] sm:$0xff] %vm84_vm0, %v388_v46 }
 0x10d   :  { %637 = shalt.err (!%p634_p10)
}
 0x10e   :  { %435 = dma.vmem_to_hbm [thread:$0]  %s430_s24, 256, %s826_s5, [#allocation7], %s698_s29, %s698_s29, %s699_s30   ;;  %v409_v51 = vld [vmem:[#allocation4 + $0x8] sm:$0xff]  ;;  %v404_v52 = vmax.f32 %v402_v49, 0.0  ;;  %407 = vst.msk [vmem:[#allocation14 + $0x8] sm:$0xff] %vm84_vm0, %v405_v50 }
 0x10f   :  { %v419_v53 = vadd.f32 %v484_v48, %v409_v51  ;;  %v408_v54 = vld [vmem:[#allocation4] sm:$0xff]  ;;  %s705_s4 = smov [#allocation16]   ;;  %s646_s12 = scalar_lea.vmem %s442_s26, 256 }
 0x110   :  { %s453_s11 = sshll.u32 %s705_s4, 4  ;;  %406 = vst.msk [vmem:[#allocation14] sm:$0xff] %vm84_vm0, %v404_v52  ;;  %v418_v55 = vadd.f32 %v484_v48, %v408_v54  ;;  %p647_p11 = scmp.ne.s32.totalorder %s442_s26, %s646_s12  ;;  %s454_s11 = int_to_ptr.vmem [resolvable:$true] %s453_s11 }
 0x111   :  { %v421_v56 = vmax.f32 %v419_v53, 0.0  ;;  %p651_p12 = scmp.lt.s32.totalorder %s442_s26, %s442_s26  ;;  %p652_p13 = scmp.lt.s32.totalorder %s646_s12, %s646_s12 }
 0x113   :  { %p653_p0 = por %p652_p13, %p651_p12 }
 0x115   :  { %p654_p1 = pnand %p653_p0, %p647_p11 }
 0x117   :  { %657 = shalt.err (!%p654_p1)
}
 0x118   :  { %447 = dma.vmem_to_hbm [thread:$0]  %s442_s26, 256, %s827_s6, [#allocation15], %s698_s29, %s698_s29, %s699_s30   ;;  %v420_v57 = vmax.f32 %v418_v55, 0.0  ;;  %423 = vst.msk [vmem:[#allocation16 + $0x8] sm:$0xff] %vm84_vm0, %v421_v56 }
 0x119   :  { %s666_s14 = scalar_lea.vmem %s454_s11, 256  ;;  %p671_p3 = scmp.lt.s32.totalorder %s454_s11, %s454_s11 }
 0x11a   :  { %422 = vst.msk [vmem:[#allocation16] sm:$0xff] %vm84_vm0, %v420_v57  ;;  %p667_p2 = scmp.ne.s32.totalorder %s454_s11, %s666_s14  ;;  %p672_p4 = scmp.lt.s32.totalorder %s666_s14, %s666_s14 }
 0x11c   :  { %p673_p5 = por %p672_p4, %p671_p3 }
 0x11e   :  { %p674_p6 = pnand %p673_p5, %p667_p2 }
 0x120   :  { %677 = shalt.err (!%p674_p6)
}
 0x121   :  { %459 = dma.vmem_to_hbm [thread:$0]  %s454_s11, 256, %s828_s7, [#allocation15], %s698_s29, %s698_s29, %s699_s30  }
 0x122   :  { %692 = dma.done.wait [#allocation7], 256  }
 0x123   :  { %693 = vsyncadd [#allocation7], 4294967040 }
 0x124   :  { %694 = dma.done.wait [#allocation15], 512  }
 0x125   :  { %695 = vsyncadd [#allocation15], 4294966784 }
 0x126   :  { %469 = vsyncpa [#allocation6], 1 }
 0x127   :  { %470 = vsyncpa [#allocation9], 1 }
 0x128   :  { %471 = vsyncpa [#allocation12], 1 }
 0x129   :  { %472 = vsyncpa [#allocation7], 1 }
 0x12a   :  { %473 = vsyncpa [#allocation15], 1 }

</bundles_post_ra>
